<compile_context>
chip_gen: v5e
topology: v5e:2x2
jax: 0.10.0
libtpu: 0.0.40
codegen_flags: <defaults>
</compile_context>

<pallas_src>
import functools

import jax
import jax.numpy as jnp
import numpy as np
from jax.experimental import pallas as pl
from jax.experimental.pallas import tpu as pltpu


def _round_up(x, m):
    return (x + m - 1) // m * m


# ---------------------------------------------------------------------------
# Fused multi-level Pallas kernel: one broadcast multiply-add per level.
# ---------------------------------------------------------------------------
def _multi_level_anchor_kernel(*refs, num_levels):
    """refs = (row0_0, ymask_0, ycol_0, ..., row0_{L-1}, ymask_{L-1}, ycol_{L-1},
               out_0, ..., out_{L-1}).

    row0_l : (1, Wp_l)  f32  base anchors tiled over x with x*stride_w added,
                             zero-padded in lanes [W_l:Wp_l]
    ymask_l: (1, Wp_l)  f32  1.0 on y-coordinate lanes (coords 1,3), 0 elsewhere
    ycol_l : (H_l, 1)   f32  row * stride_h
    out_l  : (H_l, Wp_l)     lane-dense output slab; valid region is [:, :W_l]
    """
    in_refs = refs[:3 * num_levels]
    out_refs = refs[3 * num_levels:]
    for lvl in range(num_levels):
        row0 = in_refs[3 * lvl][...]       # (1, Wp)
        ymask = in_refs[3 * lvl + 1][...]  # (1, Wp)
        ycol = in_refs[3 * lvl + 2][...]   # (H, 1)
        o_ref = out_refs[lvl]
        o_ref[...] = (row0 + ycol * ymask).astype(o_ref.dtype)


# ---------------------------------------------------------------------------
# Module-equivalent wrapper.
# ---------------------------------------------------------------------------
class YOLOAnchorGeneratorPallas:
    def __init__(self, strides, base_sizes):
        self.strides = [tuple(s) if isinstance(s, (tuple, list)) else (s, s)
                        for s in strides]
        self.centers = [(s[0] / 2.0, s[1] / 2.0) for s in self.strides]
        self.base_sizes = [[tuple(bs) if isinstance(bs, (tuple, list)) else (bs, bs)
                            for bs in level] for level in base_sizes]
        self.base_anchors_np = self._gen_base_anchors()
        self.base_anchors = [jnp.asarray(b) for b in self.base_anchors_np]
        # Memoized results keyed by (featmap_sizes, dtype-name).
        self._cache = {}

    @property
    def num_levels(self):
        return len(self.base_sizes)

    def _gen_base_anchors(self):
        multi_level = []
        for i, base_sizes_per_level in enumerate(self.base_sizes):
            x_c, y_c = self.centers[i]
            anchors = []
            for (w, h) in base_sizes_per_level:
                anchors.append([x_c - 0.5 * w, y_c - 0.5 * h,
                                x_c + 0.5 * w, y_c + 0.5 * h])
            multi_level.append(np.asarray(anchors, dtype=np.float32))
        return multi_level

    def _build_level_params(self, lvl, feat_h, feat_w):
        """Tiny host-side precompute for one level (runs once per cache key)."""
        base = self.base_anchors_np[lvl]                   # (A, 4)
        A = base.shape[0]
        stride_w, stride_h = self.strides[lvl]
        W = feat_w * A * 4
        Wp = _round_up(W, 128)                             # lane-dense width

        xs = np.arange(feat_w, dtype=np.float32) * float(stride_w)
        zeros = np.zeros_like(xs)
        x_shift = np.stack([xs, zeros, xs, zeros], axis=-1)        # (feat_w, 4)

        row0 = np.zeros((1, Wp), np.float32)
        row0[0, :W] = (base[None, :, :] + x_shift[:, None, :]).reshape(W)

        ymask = np.zeros((1, Wp), np.float32)
        ymask[0, :W] = np.tile(np.array([0.0, 1.0, 0.0, 1.0], np.float32),
                               feat_w * A)

        ycol = (np.arange(feat_h, dtype=np.float32)
                * float(stride_h)).reshape(feat_h, 1)

        return row0, ymask, ycol, W, Wp, A

    def __call__(self, featmap_sizes, dtype=jnp.float32):
        sizes = tuple((int(h), int(w)) for (h, w) in featmap_sizes)
        assert len(sizes) == self.num_levels
        cache_key = (sizes, jnp.dtype(dtype).name)
        cached = self._cache.get(cache_key)
        if cached is not None:
            return list(cached)

        inputs = []
        out_shapes = []
        meta = []
        for lvl, (feat_h, feat_w) in enumerate(sizes):
            row0, ymask, ycol, W, Wp, A = self._build_level_params(lvl, feat_h, feat_w)
            inputs.extend([jnp.asarray(row0), jnp.asarray(ymask), jnp.asarray(ycol)])
            out_shapes.append(jax.ShapeDtypeStruct((feat_h, Wp), dtype))
            meta.append((feat_h, feat_w, A, W))

        kernel = functools.partial(_multi_level_anchor_kernel,
                                   num_levels=self.num_levels)
        vmem_spec = pl.BlockSpec(memory_space=pltpu.MemorySpace.VMEM)

        # Gridless call: whole arrays resident in VMEM, no pipeline overhead.
        outs = pl.pallas_call(
            kernel,
            out_shape=tuple(out_shapes),
            in_specs=[vmem_spec] * len(inputs),
            out_specs=tuple([vmem_spec] * self.num_levels),
        )(*inputs)

        # (feat_h, Wp) lane-dense slab -> drop pad lanes -> (feat_h*feat_w*A, 4):
        # identical element order to PyTorch `all_anchors.reshape(-1, 4)`.
        multi_level_anchors = []
        for out, (feat_h, feat_w, A, W) in zip(outs, meta):
            anchors = out[:, :W].reshape(feat_h * feat_w * A, 4)
            multi_level_anchors.append(anchors)
        multi_level_anchors = [jax.block_until_ready(a) for a in multi_level_anchors]

        self._cache[cache_key] = tuple(multi_level_anchors)
        return list(multi_level_anchors)


# ---------------------------------------------------------------------------
# Pure-JAX reference (mirrors the PyTorch forward exactly) for verification.
# ---------------------------------------------------------------------------
def _ref_single_level(base_anchors, featmap_size, stride, dtype=jnp.float32):
    feat_h, feat_w = featmap_size
    stride_w, stride_h = stride
    shift_x = jnp.arange(0, feat_w, dtype=dtype) * stride_w
    shift_y = jnp.arange(0, feat_h, dtype=dtype) * stride_h
    shift_xx = jnp.tile(shift_x, feat_h)
    shift_yy = jnp.repeat(shift_y, feat_w)
    shifts = jnp.stack([shift_xx, shift_yy, shift_xx, shift_yy], axis=-1)
    all_anchors = base_anchors.astype(dtype)[None, :, :] + shifts[:, None, :]
    return all_anchors.reshape(-1, 4)


if __name__ == "__main__":
    # YOLOv3-style config (strides / base sizes are module hyperparameters).
    strides = [32, 16, 8]
    base_sizes = [
        [(116, 90), (156, 198), (373, 326)],
        [(30, 61), (62, 45), (59, 119)],
        [(10, 13), (16, 30), (33, 23)],
    ]
    gen = YOLOAnchorGeneratorPallas(strides, base_sizes)

    # Deterministic dummy multi-level feature maps (batch=2, channels=4);
    # the forward only consumes their spatial sizes (as in the PyTorch module).
    key = jax.random.PRNGKey(0)
    keys = jax.random.split(key, 3)
    feats = [
        jax.random.normal(keys[0], (2, 4, 4, 4), jnp.float32),
        jax.random.normal(keys[1], (2, 4, 8, 8), jnp.float32),
        jax.random.normal(keys[2], (2, 4, 16, 16), jnp.float32),
    ]
    featmap_sizes = [f.shape[-2:] for f in feats]

    anchors = gen(featmap_sizes, dtype=jnp.float32)
    anchors = [jax.block_until_ready(a) for a in anchors]

    # Second call exercises the memoization path (no kernel dispatch / uploads).
    anchors2 = gen(featmap_sizes, dtype=jnp.float32)

    # Verify against the pure-JAX reference of the PyTorch semantics.
    for i in range(gen.num_levels):
        ref = _ref_single_level(gen.base_anchors[i], featmap_sizes[i], gen.strides[i])
        fh, fw = featmap_sizes[i]
        A = gen.base_anchors[i].shape[0]
        assert anchors[i].shape == (fh * fw * A, 4), anchors[i].shape
        np.testing.assert_allclose(np.asarray(anchors[i]), np.asarray(ref),
                                   rtol=0, atol=0)
        np.testing.assert_allclose(np.asarray(anchors2[i]), np.asarray(ref),
                                   rtol=0, atol=0)

    print("KERNEL_OK")
</pallas_src>

<mosaic_0001>
module attributes {stable_mosaic.version = 11 : i64} {
  func.func @_multi_level_anchor_kernel(%arg0: memref<1x128xf32, #tpu.memory_space<vmem>>, %arg1: memref<1x128xf32, #tpu.memory_space<vmem>>, %arg2: memref<4x1xf32, #tpu.memory_space<vmem>>, %arg3: memref<1x128xf32, #tpu.memory_space<vmem>>, %arg4: memref<1x128xf32, #tpu.memory_space<vmem>>, %arg5: memref<8x1xf32, #tpu.memory_space<vmem>>, %arg6: memref<1x256xf32, #tpu.memory_space<vmem>>, %arg7: memref<1x256xf32, #tpu.memory_space<vmem>>, %arg8: memref<16x1xf32, #tpu.memory_space<vmem>>, %arg9: memref<4x128xf32, #tpu.memory_space<vmem>>, %arg10: memref<8x128xf32, #tpu.memory_space<vmem>>, %arg11: memref<16x256xf32, #tpu.memory_space<vmem>>) attributes {dimension_semantics = [], scalar_prefetch = 0 : i64, scratch_operands = 0 : i64, tpu.core_type = #tpu.core_type<tc>} {
    %c0 = arith.constant 0 : index
    %c0_0 = arith.constant 0 : index
    %0 = vector.load %arg0[%c0, %c0_0] : memref<1x128xf32, #tpu.memory_space<vmem>>, vector<1x128xf32>
    %c0_1 = arith.constant 0 : index
    %c0_2 = arith.constant 0 : index
    %1 = vector.load %arg1[%c0_1, %c0_2] : memref<1x128xf32, #tpu.memory_space<vmem>>, vector<1x128xf32>
    %c0_3 = arith.constant 0 : index
    %c0_4 = arith.constant 0 : index
    %2 = vector.load %arg2[%c0_3, %c0_4] : memref<4x1xf32, #tpu.memory_space<vmem>>, vector<4x1xf32>
    %3 = vector.broadcast %2 : vector<4x1xf32> to vector<4x128xf32>
    %4 = vector.broadcast %1 : vector<1x128xf32> to vector<4x128xf32>
    %5 = arith.mulf %3, %4 : vector<4x128xf32>
    %6 = vector.broadcast %0 : vector<1x128xf32> to vector<4x128xf32>
    %7 = arith.addf %6, %5 : vector<4x128xf32>
    %c0_5 = arith.constant 0 : index
    %c0_6 = arith.constant 0 : index
    %8 = vector.load %arg9[%c0_5, %c0_6] : memref<4x128xf32, #tpu.memory_space<vmem>>, vector<4x128xf32>
    tpu.vector_store %arg9[%c0_5, %c0_6], %7 {strides = array<i32>} : memref<4x128xf32, #tpu.memory_space<vmem>>, vector<4x128xf32>,
    %c0_7 = arith.constant 0 : index
    %c0_8 = arith.constant 0 : index
    %9 = vector.load %arg3[%c0_7, %c0_8] : memref<1x128xf32, #tpu.memory_space<vmem>>, vector<1x128xf32>
    %c0_9 = arith.constant 0 : index
    %c0_10 = arith.constant 0 : index
    %10 = vector.load %arg4[%c0_9, %c0_10] : memref<1x128xf32, #tpu.memory_space<vmem>>, vector<1x128xf32>
    %c0_11 = arith.constant 0 : index
    %c0_12 = arith.constant 0 : index
    %11 = vector.load %arg5[%c0_11, %c0_12] : memref<8x1xf32, #tpu.memory_space<vmem>>, vector<8x1xf32>
    %12 = vector.broadcast %11 : vector<8x1xf32> to vector<8x128xf32>
    %13 = vector.broadcast %10 : vector<1x128xf32> to vector<8x128xf32>
    %14 = arith.mulf %12, %13 : vector<8x128xf32>
    %15 = vector.broadcast %9 : vector<1x128xf32> to vector<8x128xf32>
    %16 = arith.addf %15, %14 : vector<8x128xf32>
    %c0_13 = arith.constant 0 : index
    %c0_14 = arith.constant 0 : index
    %17 = vector.load %arg10[%c0_13, %c0_14] : memref<8x128xf32, #tpu.memory_space<vmem>>, vector<8x128xf32>
    tpu.vector_store %arg10[%c0_13, %c0_14], %16 {strides = array<i32>} : memref<8x128xf32, #tpu.memory_space<vmem>>, vector<8x128xf32>,
    %c0_15 = arith.constant 0 : index
    %c0_16 = arith.constant 0 : index
    %18 = vector.load %arg6[%c0_15, %c0_16] : memref<1x256xf32, #tpu.memory_space<vmem>>, vector<1x256xf32>
    %c0_17 = arith.constant 0 : index
    %c0_18 = arith.constant 0 : index
    %19 = vector.load %arg7[%c0_17, %c0_18] : memref<1x256xf32, #tpu.memory_space<vmem>>, vector<1x256xf32>
    %c0_19 = arith.constant 0 : index
    %c0_20 = arith.constant 0 : index
    %20 = vector.load %arg8[%c0_19, %c0_20] : memref<16x1xf32, #tpu.memory_space<vmem>>, vector<16x1xf32>
    %21 = vector.broadcast %20 : vector<16x1xf32> to vector<16x256xf32>
    %22 = vector.broadcast %19 : vector<1x256xf32> to vector<16x256xf32>
    %23 = arith.mulf %21, %22 : vector<16x256xf32>
    %24 = vector.broadcast %18 : vector<1x256xf32> to vector<16x256xf32>
    %25 = arith.addf %24, %23 : vector<16x256xf32>
    %c0_21 = arith.constant 0 : index
    %c0_22 = arith.constant 0 : index
    %26 = vector.load %arg11[%c0_21, %c0_22] : memref<16x256xf32, #tpu.memory_space<vmem>>, vector<16x256xf32>
    tpu.vector_store %arg11[%c0_21, %c0_22], %25 {strides = array<i32>} : memref<16x256xf32, #tpu.memory_space<vmem>>, vector<16x256xf32>,
    return
  }
}

</mosaic_0001>

<bundles_post_ra>
// kernel: tpu_custom_call.1
= control target key start
LH: loop header
LB: loop body
LE: loop exit
PB: predicated region body
PF: predicated region fallthrough
CT: control target
= control target key end

     0   :  { %17 = vsyncpa [#allocation3], 0  ;;  %v244_v2 = vmov 0   ;;  %s349_s0 = inlined_call_operand.vmem [shape: f32[1,128], index: 0, kind: input, shape index: {}]   ;;  %s350_s1 = inlined_call_operand.vmem [shape: f32[1,128], index: 1, kind: input, shape index: {}]   ;;  %s351_s2 = inlined_call_operand.vmem [shape: f32[4,1], index: 2, kind: input, shape index: {}]   ;;  %s352_s3 = inlined_call_operand.vmem [shape: f32[1,128], index: 3, kind: input, shape index: {}]   ;;  %s353_s4 = inlined_call_operand.vmem [shape: f32[1,128], index: 4, kind: input, shape index: {}]   ;;  %s354_s5 = inlined_call_operand.vmem [shape: f32[8,1], index: 5, kind: input, shape index: {}]   ;;  %s355_s6 = inlined_call_operand.vmem [shape: f32[1,256], index: 6, kind: input, shape index: {}]   ;;  %s356_s7 = inlined_call_operand.vmem [shape: f32[1,256], index: 7, kind: input, shape index: {}]   ;;  %s357_s8 = inlined_call_operand.vmem [shape: f32[16,1], index: 8, kind: input, shape index: {}]   ;;  %s358_s9 = inlined_call_operand.hbm [shape: f32[4,128], index: 9, kind: output, shape index: {0}]   ;;  %s359_s10 = inlined_call_operand.hbm [shape: f32[8,128], index: 10, kind: output, shape index: {1}]   ;;  %s360_s11 = inlined_call_operand.hbm [shape: f32[16,256], index: 11, kind: output, shape index: {2}]  }
   0x1   :  { %v73_v0 = vld [vmem:[%s357_s8] sm:$0xff]  ;;  %163 = vset.pattern.permute.xlu1 %v244_v2  ;;  %162 = vset.pattern.permute.xlu0 %v244_v2 }
   0x2   :  { %v56_v1 = vld [vmem:[%s354_s5] sm:$0xff]  ;;  %77 = vperm.xlu1 %163, %v73_v0  }
   0x3   :  { %59 = vperm.xlu0 %162, %v56_v1  }
   0x4   :  { %18 = vsyncpa [#allocation5], 0  ;;  %v74_v3 = vld [vmem:[%s357_s8 + $0x8] sm:$0xff]  ;;  %v39_v4 = vld [vmem:[%s351_s2] sm:$0xf]  ;;  %s125_s13 = sshll.u32 %s359_s10, 4  ;;  %s126_s13 = int_to_ptr.hbm [resolvable:$true] %s125_s13 }
   0x5   :  { %v72_v5 = vld [vmem:[%s356_s7] sm:$0x3]  ;;  %s245_s7 = smov [#allocation4]   ;;  %s246_s16 = smov [#allocation6]  }
   0x6   :  { %v71_v6 = vld [vmem:[%s355_s6] sm:$0x3]  ;;  %v86_v7 = vperm.slane %v72_v5, 0  ;;  %v87_v8 = vperm.slane %v72_v5, 1  ;;  %s123_s30 = sshll.u32 %s245_s7, 4  ;;  %s133_s17 = sshll.u32 %s246_s16, 4  ;;  %s124_s30 = int_to_ptr.vmem [resolvable:$true] %s123_s30  ;;  %s134_s17 = int_to_ptr.vmem [resolvable:$true] %s133_s17 }
   0x7   :  { %v164_v9 = vld [vmem:[%s353_s4] ss:$0 sm:$0xff]  ;;  %v95_v10 = vperm.slane %v71_v6, 0  ;;  %v96_v11 = vperm.slane %v71_v6, 1  ;;  %s135_s19 = sshll.u32 %s360_s11, 4  ;;  %s114_s23 = sshll.u32 %s358_s9, 4  ;;  %s136_s19 = int_to_ptr.hbm [resolvable:$true] %s135_s19  ;;  %s115_s23 = int_to_ptr.hbm [resolvable:$true] %s114_s23 }
   0x8   :  { %v165_v12 = vld [vmem:[%s352_s3] ss:$0 sm:$0xff]  ;;  %s249_s11 = smov 16  }
   0x9   :  { %v166_v21 = vld [vmem:[%s350_s1] ss:$0 sm:$0xff]  ;;  %s247_s1 = smov [#allocation2]  }
   0xa   :  { %82 = vperm.xlu1 %163, %v74_v3   ;;  %v167_v22 = vld [vmem:[%s349_s0] ss:$0 sm:$0xff]  ;;  %s112_s20 = sshll.u32 %s247_s1, 4  ;;  %s248_s0 = smov 256   ;;  %s113_s20 = int_to_ptr.vmem [resolvable:$true] %s112_s20 }
   0xb   :  { %42 = vperm.xlu0 %162, %v39_v4  }
  0x74   :  { %v78_v13 = vpop.permute.xlu1 %77 }
  0x75   :  { %v60_v14 = vpop.permute.xlu0 %59  ;;  %v90_v15 = vmul.f32 %v86_v7, %v78_v13  ;;  %v91_v16 = vmul.f32 %v87_v8, %v78_v13 }
  0x76   :  { %v65_v17 = vmul.f32 %v164_v9, %v60_v14 }
  0x77   :  { %v99_v18 = vadd.f32 %v95_v10, %v90_v15  ;;  %v100_v19 = vadd.f32 %v96_v11, %v91_v16 }
  0x78   :  { %v69_v20 = vadd.f32 %v165_v12, %v65_v17 }
  0x79   :  { %103 = vst [vmem:[#allocation6] sm:$0xff] %v99_v18 }
  0x7a   :  { %104 = vst [vmem:[#allocation6 + $0x8] sm:$0xff] %v100_v19 }
  0x7b   :  { %70 = vst [vmem:[#allocation4] sm:$0xff] %v69_v20 }
  0x7c   :  { %v83_v23 = vpop.permute.xlu1 %82  ;;  %128 = dma.vmem_to_hbm [thread:$0]  %s124_s30, 128, %s126_s13, [#allocation5]  }
  0x7d   :  { %v43_v24 = vpop.permute.xlu0 %42  ;;  %v92_v25 = vmul.f32 %v86_v7, %v83_v23  ;;  %v93_v26 = vmul.f32 %v87_v8, %v83_v23 }
  0x7e   :  { %v48_v27 = vmul.f32 %v166_v21, %v43_v24 }
  0x7f   :  { %v101_v28 = vadd.f32 %v95_v10, %v92_v25  ;;  %v102_v29 = vadd.f32 %v96_v11, %v93_v26 }
  0x80   :  { %v52_v30 = vadd.f32 %v167_v22, %v48_v27 }
  0x81   :  { %105 = vst [vmem:[#allocation6 + $0x10] sm:$0xff] %v101_v28 }
  0x82   :  { %106 = vst [vmem:[#allocation6 + $0x18] sm:$0xff] %v102_v29 }
  0x83   :  { %53 = vst [vmem:[#allocation2] sm:$0xf] %v52_v30  ;;  %141 = dma.vmem_to_hbm [thread:$0]  %s134_s17, 512, %s136_s19, [#allocation5], %s248_s0, %s248_s0, %s249_s11  }
  0x84   :  { %117 = dma.vmem_to_hbm [thread:$0]  %s113_s20, 64, %s115_s23, [#allocation3]  }
  0x85   :  { %240 = dma.done.wait [#allocation3], 64  }
  0x86   :  { %241 = vsyncadd [#allocation3], 4294967232 }
  0x87   :  { %242 = dma.done.wait [#allocation5], 640  }
  0x88   :  { %243 = vsyncadd [#allocation5], 4294966656 }
  0x89   :  { %154 = vsyncpa [#allocation3], 1 }
  0x8a   :  { %155 = vsyncpa [#allocation5], 1 }

</bundles_post_ra>
